<compile_context>
chip_gen: v7x
topology: tpu7x:2x2x1
jax: 0.10.0
libtpu: 0.0.40
codegen_flags: <defaults>
</compile_context>

<pallas_src>
import jax
import jax.numpy as jnp
from jax.experimental import pallas as pl
from jax.experimental.pallas import tpu as pltpu


def _round_up(x, m):
    return ((x + m - 1) // m) * m


def _fused_conv1x1_kernel(x_ref, w1_ref, b1_ref, w2_ref, b2_ref, o_ref):
    # x_ref : (Cin, T)   lane-dense pixel tile
    # w1_ref: (C1, Cin)  b1_ref: (C1, 1)
    # w2_ref: (C2, C1)   b2_ref: (C2, 1)
    # o_ref : (C2, T)
    x = x_ref[...].astype(jnp.float32)
    h = jnp.dot(w1_ref[...], x, preferred_element_type=jnp.float32)       # (C1, T)
    h = jnp.maximum(h + b1_ref[...], 0.0)                                 # backbone stand-in ReLU
    y = jnp.dot(w2_ref[...], h, preferred_element_type=jnp.float32)       # (C2, T)
    o_ref[...] = (y + b2_ref[...]).astype(o_ref.dtype)


def hrnet_small_forward(x, params, *, tile_hw=16384, out_dtype=None):
    """Fused forward: x (N,3,H,W) -> 19-ch stand-in backbone -> final 1x1 conv -> (N,8,H,W)."""
    N, Cin, H, W = x.shape
    w1 = params["backbone_w"].reshape(-1, Cin).astype(jnp.float32)        # (19, 3)
    b1 = params["backbone_b"].reshape(-1, 1).astype(jnp.float32)          # (19, 1)
    C1 = w1.shape[0]
    w2 = params["final_w"].reshape(-1, C1).astype(jnp.float32)            # (8, 19)
    b2 = params["final_b"].reshape(-1, 1).astype(jnp.float32)             # (8, 1)
    C2 = w2.shape[0]
    out_dtype = x.dtype if out_dtype is None else jnp.dtype(out_dtype)

    HW = H * W
    # Pixel tile: multiple of 128 lanes, large (default 16K) but never bigger
    # than the (128-rounded) image.  No explicit padding: Pallas pads the last
    # partial block on load and masks it on store.
    tile = min(_round_up(tile_hw, 128), _round_up(HW, 128))
    grid = (pl.cdiv(HW, tile), N)                  # pixel axis leading -> megacore shards it

    x3 = x.reshape(N, Cin, HW)                     # NCHW is already (C, HW)-contiguous

    in_bytes = jnp.dtype(x.dtype).itemsize
    out_bytes = jnp.dtype(out_dtype).itemsize
    cost = pl.CostEstimate(
        flops=2 * N * HW * (Cin * C1 + C1 * C2),
        transcendentals=0,
        bytes_accessed=N * HW * (Cin * in_bytes + C2 * out_bytes)
        + 4 * (w1.size + b1.size + w2.size + b2.size),
    )

    out = pl.pallas_call(
        _fused_conv1x1_kernel,
        out_shape=jax.ShapeDtypeStruct((N, C2, HW), out_dtype),
        grid_spec=pltpu.PrefetchScalarGridSpec(
            num_scalar_prefetch=0,
            grid=grid,
            in_specs=[
                pl.BlockSpec((None, Cin, tile), lambda p, n: (n, 0, p)),   # pixel tile, N squeezed
                pl.BlockSpec((C1, Cin), lambda p, n: (0, 0)),              # W1 resident
                pl.BlockSpec((C1, 1), lambda p, n: (0, 0)),                # b1
                pl.BlockSpec((C2, C1), lambda p, n: (0, 0)),               # W2 resident
                pl.BlockSpec((C2, 1), lambda p, n: (0, 0)),                # b2
            ],
            out_specs=pl.BlockSpec((None, C2, tile), lambda p, n: (n, 0, p)),
        ),
        compiler_params=pltpu.CompilerParams(
            dimension_semantics=("parallel", "parallel"),
            vmem_limit_bytes=32 * 1024 * 1024,     # explicit budget: safe on v5e/v6e/v7x
        ),
        cost_estimate=cost,
    )(x3, w1, b1, w2, b2)

    return out.reshape(N, C2, H, W)


def init_conv_params(key, cout, cin):
    """Deterministic PyTorch-style Conv2d(kernel=1) init (kaiming-uniform bounds)."""
    kw, kb = jax.random.split(key)
    bound = 1.0 / jnp.sqrt(jnp.float32(cin))
    w = jax.random.uniform(kw, (cout, cin, 1, 1), jnp.float32, -bound, bound)
    b = jax.random.uniform(kb, (cout,), jnp.float32, -bound, bound)
    return w, b


def _reference(x, params):
    w1 = params["backbone_w"].reshape(-1, x.shape[1])
    b1 = params["backbone_b"]
    w2 = params["final_w"].reshape(-1, w1.shape[0])
    b2 = params["final_b"]
    h = jnp.maximum(jnp.einsum("nchw,oc->nohw", x, w1) + b1[None, :, None, None], 0.0)
    return jnp.einsum("nchw,oc->nohw", h, w2) + b2[None, :, None, None]


if __name__ == "__main__":
    key = jax.random.PRNGKey(0)
    k_x, k_x2, k_bb, k_fc = jax.random.split(key, 4)

    bb_w, bb_b = init_conv_params(k_bb, 19, 3)   # backbone stand-in: 3 -> 19
    fc_w, fc_b = init_conv_params(k_fc, 8, 19)   # final_conv:        19 -> 8
    params = {
        "backbone_w": bb_w, "backbone_b": bb_b,
        "final_w": fc_w, "final_b": fc_b,
    }

    # Case 1: small RGB NCHW input, HW divisible by 128.
    N, C, H, W = 2, 3, 16, 16
    x = jax.random.normal(k_x, (N, C, H, W), jnp.float32)
    out = jax.block_until_ready(hrnet_small_forward(x, params))
    ref = _reference(x, params)
    assert out.shape == (N, 8, H, W), out.shape
    assert out.dtype == jnp.float32
    assert jnp.allclose(out, ref, atol=1e-4, rtol=1e-4)

    # Case 2: ragged spatial size (exercises the partial-edge-block path, no pad/slice).
    H2, W2 = 9, 13
    x2 = jax.random.normal(k_x2, (N, C, H2, W2), jnp.float32)
    out2 = jax.block_until_ready(hrnet_small_forward(x2, params))
    assert out2.shape == (N, 8, H2, W2), out2.shape
    assert jnp.allclose(out2, _reference(x2, params), atol=1e-4, rtol=1e-4)

    # Case 3: optional bf16 output (halves dominant store traffic), f32 accumulation.
    out3 = jax.block_until_ready(hrnet_small_forward(x, params, out_dtype=jnp.bfloat16))
    assert out3.shape == (N, 8, H, W)
    assert out3.dtype == jnp.bfloat16
    assert jnp.allclose(out3.astype(jnp.float32), ref, atol=1e-1, rtol=1e-1)

    print("KERNEL_OK")
</pallas_src>

<mosaic_0001>
module attributes {stable_mosaic.version = 11 : i64} {
  func.func @_fused_conv1x1_kernel(%arg0: i32, %arg1: i32, %arg2: memref<1x3x256xf32, #tpu.memory_space<vmem>>, %arg3: memref<19x3xf32, #tpu.memory_space<vmem>>, %arg4: memref<19x1xf32, #tpu.memory_space<vmem>>, %arg5: memref<8x19xf32, #tpu.memory_space<vmem>>, %arg6: memref<8x1xf32, #tpu.memory_space<vmem>>, %arg7: memref<1x8x256xf32, #tpu.memory_space<vmem>>) attributes {dimension_semantics = [#tpu.dimension_semantics<parallel>, #tpu.dimension_semantics<parallel>], iteration_bounds = array<i64: 1, 2>, scalar_prefetch = 0 : i64, scratch_operands = 0 : i64, tpu.core_type = #tpu.core_type<tc>, window_params = [{transform_indices = @transform_0, window_bounds = array<i64: 1, 3, 256>}, {pipeline_mode = #tpu.pipeline_mode<synchronous>, transform_indices = @transform_1, window_bounds = array<i64: 19, 3>}, {pipeline_mode = #tpu.pipeline_mode<synchronous>, transform_indices = @transform_2, window_bounds = array<i64: 19, 1>}, {pipeline_mode = #tpu.pipeline_mode<synchronous>, transform_indices = @transform_3, window_bounds = array<i64: 8, 19>}, {pipeline_mode = #tpu.pipeline_mode<synchronous>, transform_indices = @transform_4, window_bounds = array<i64: 8, 1>}, {transform_indices = @transform_5, window_bounds = array<i64: 1, 8, 256>}]} {
    %c0 = arith.constant 0 : index
    %c0_0 = arith.constant 0 : index
    %c0_1 = arith.constant 0 : index
    %0 = vector.load %arg2[%c0, %c0_0, %c0_1] : memref<1x3x256xf32, #tpu.memory_space<vmem>>, vector<1x3x256xf32>
    %1 = vector.shape_cast %0 : vector<1x3x256xf32> to vector<3x256xf32>
    %c0_2 = arith.constant 0 : index
    %c0_3 = arith.constant 0 : index
    %2 = vector.load %arg3[%c0_2, %c0_3] : memref<19x3xf32, #tpu.memory_space<vmem>>, vector<19x3xf32>
    %cst = arith.constant dense<0.000000e+00> : vector<19x256xf32>
    %3 = tpu.matmul %2, %1, %cst {dimension_numbers = #tpu.dot_dimension_numbers<[1], [0], [0], [1], [0, 0, 1, 1], [], []>} : vector<19x3xf32>, vector<3x256xf32>, vector<19x256xf32> -> vector<19x256xf32>
    %c0_4 = arith.constant 0 : index
    %c0_5 = arith.constant 0 : index
    %4 = vector.load %arg4[%c0_4, %c0_5] : memref<19x1xf32, #tpu.memory_space<vmem>>, vector<19x1xf32>
    %5 = vector.broadcast %4 : vector<19x1xf32> to vector<19x256xf32>
    %6 = arith.addf %3, %5 : vector<19x256xf32>
    %cst_6 = arith.constant 0.000000e+00 : f32
    %7 = vector.broadcast %cst_6 : f32 to vector<19x256xf32>
    %8 = arith.maximumf %6, %7 : vector<19x256xf32>
    %c0_7 = arith.constant 0 : index
    %c0_8 = arith.constant 0 : index
    %9 = vector.load %arg5[%c0_7, %c0_8] : memref<8x19xf32, #tpu.memory_space<vmem>>, vector<8x19xf32>
    %cst_9 = arith.constant dense<0.000000e+00> : vector<8x256xf32>
    %10 = tpu.matmul %9, %8, %cst_9 {dimension_numbers = #tpu.dot_dimension_numbers<[1], [0], [0], [1], [0, 0, 1, 1], [], []>} : vector<8x19xf32>, vector<19x256xf32>, vector<8x256xf32> -> vector<8x256xf32>
    %c0_10 = arith.constant 0 : index
    %c0_11 = arith.constant 0 : index
    %11 = vector.load %arg6[%c0_10, %c0_11] : memref<8x1xf32, #tpu.memory_space<vmem>>, vector<8x1xf32>
    %12 = vector.broadcast %11 : vector<8x1xf32> to vector<8x256xf32>
    %13 = arith.addf %10, %12 : vector<8x256xf32>
    %c0_12 = arith.constant 0 : index
    %c0_13 = arith.constant 0 : index
    %c0_14 = arith.constant 0 : index
    %14 = vector.load %arg7[%c0_12, %c0_13, %c0_14] : memref<1x8x256xf32, #tpu.memory_space<vmem>>, vector<1x8x256xf32>
    %15 = vector.shape_cast %14 : vector<1x8x256xf32> to vector<8x256xf32>
    %16 = vector.shape_cast %13 : vector<8x256xf32> to vector<1x8x256xf32>
    tpu.vector_store %arg7[%c0_12, %c0_13, %c0_14], %16 {strides = array<i32>} : memref<1x8x256xf32, #tpu.memory_space<vmem>>, vector<1x8x256xf32>,
    return
  }
  func.func @transform_0(%arg0: i32, %arg1: i32) -> (i32, i32, i32) {
    %c0_i32 = arith.constant 0 : i32
    %c0_i32_0 = arith.constant 0 : i32
    return %arg1, %c0_i32, %arg0 : i32, i32, i32
  }
  func.func @transform_1(%arg0: i32, %arg1: i32) -> (i32, i32) {
    %c0_i32 = arith.constant 0 : i32
    %c0_i32_0 = arith.constant 0 : i32
    %c0_i32_1 = arith.constant 0 : i32
    return %c0_i32, %c0_i32_0 : i32, i32
  }
  func.func @transform_2(%arg0: i32, %arg1: i32) -> (i32, i32) {
    %c0_i32 = arith.constant 0 : i32
    %c0_i32_0 = arith.constant 0 : i32
    %c0_i32_1 = arith.constant 0 : i32
    return %c0_i32, %c0_i32_0 : i32, i32
  }
  func.func @transform_3(%arg0: i32, %arg1: i32) -> (i32, i32) {
    %c0_i32 = arith.constant 0 : i32
    %c0_i32_0 = arith.constant 0 : i32
    %c0_i32_1 = arith.constant 0 : i32
    return %c0_i32, %c0_i32_0 : i32, i32
  }
  func.func @transform_4(%arg0: i32, %arg1: i32) -> (i32, i32) {
    %c0_i32 = arith.constant 0 : i32
    %c0_i32_0 = arith.constant 0 : i32
    %c0_i32_1 = arith.constant 0 : i32
    return %c0_i32, %c0_i32_0 : i32, i32
  }
  func.func @transform_5(%arg0: i32, %arg1: i32) -> (i32, i32, i32) {
    %c0_i32 = arith.constant 0 : i32
    %c0_i32_0 = arith.constant 0 : i32
    return %arg1, %c0_i32, %arg0 : i32, i32, i32
  }
}

</mosaic_0001>

<bundles_post_ra>
// kernel: tpu_custom_call.1
= control target key start
LH: loop header
LB: loop body
LE: loop exit
PB: predicated region body
PF: predicated region fallthrough
CT: control target
= control target key end

     0   :  { %10 = vsyncpa [#allocation3], 0  ;;  %s905_s0 = inlined_call_operand.vmem [shape: f32[2,3,256], index: 0, kind: input, shape index: {}]   ;;  %s906_s1 = inlined_call_operand.vmem [shape: f32[19,3], index: 1, kind: input, shape index: {}]   ;;  %s907_s2 = inlined_call_operand.vmem [shape: f32[19,1], index: 2, kind: input, shape index: {}]   ;;  %s908_s3 = inlined_call_operand.vmem [shape: f32[8,19], index: 3, kind: input, shape index: {}]   ;;  %s909_s4 = inlined_call_operand.vmem [shape: f32[8,1], index: 4, kind: input, shape index: {}]   ;;  %s910_s5 = inlined_call_operand.hbm [shape: f32[2,8,256], index: 5, kind: output, shape index: {}]  }
   0x1   :  { %12 = vsyncpa [#allocation3 + $0x1], 0  ;;  %s765_s18 = smov 0   ;;  %s767_s19 = smov 0  }
   0x2   :  { %s769_s20 = smov 0   ;;  %s771_s21 = smov 0  }
   0x3   :  { %s773_s22 = smov 0   ;;  %s775_s23 = smov 0  }
   0x4 LB: > { %s565_s24 = sadd.s32 4294967295, %s730_s23   ;;  %s566_s25 = sadd.s32 4294967294, %s730_s23   ;;  %s730_s23 = sphi %s775_s23, %s18_s23   ;;  %s726_s22 = sphi %s773_s22, %s917_s22   ;;  %s722_s21 = sphi %s771_s21, %s916_s21   ;;  %s718_s20 = sphi %s769_s20, %s915_s20   ;;  %s714_s19 = sphi %s767_s19, %s914_s19   ;;  %s710_s18 = sphi %s765_s18, %s913_s18  }
   0x5   : > { %s27_s26 = sadd.s32 1, %s726_s22  ;;  %s151_s27 = sadd.s32 1, %s718_s20 }
   0x6   : > { %p28_p0 = scmp.ge.s32.totalorder %s27_s26, 2  ;;  %p161_p1 = scmp.ne.s32.totalorder %s718_s20, %s714_s19 }
   0x7   : > { %p162_p2 = scmp.eq.s32.totalorder %s565_s24, 1  ;;  %p167_p3 = scmp.ne.s32.totalorder %s714_s19, %s710_s18 }
   0x8   : > { %s919_s26 = smov (%p28_p0, %s27_s26), 0  ;;  %p168_p5 = scmp.eq.s32.totalorder %s566_s25, 1 }
   0x9   : > { %p805_p4 = por %p162_p2, %p161_p1  ;;  %s146_s29 = ssub.s32 %s726_s22, %s919_s26 }
   0xa   : > { %p569_p6 = scmp.ge.s32.totalorder %s730_s23, 1  ;;  %p149_p7 = scmp.eq.s32.totalorder %s146_s29, 0 }
   0xb   : > { %p812_p8 = por %p168_p5, %p167_p3  ;;  %p211_p9 = scmp.lt.s32.totalorder %s730_s23, 3 }
   0xc   : > { %s818_s6 = scalar_select %p149_p7, %s718_s20, %s151_s27  }
   0xd   : > { %p212_p10 = pnand %p569_p6, %p211_p9 }
   0xe   : > { %p244_p11 = scmp.lt.s32.totalorder (!%p212_p10), %s722_s21, 1  ;;  %v732_v0 = vmov (!%p212_p10), 0.0   ;;  %v258_v1 = vld [vmem:[%s907_s2] sm:$0xff] (!%p212_p10)  ;;  %v733_v2 = vmov (!%p212_p10), 0   ;;  %v260_v3 = vld [vmem:[%s907_s2 + $0x10] sm:$0x7] (!%p212_p10) }
   0xf   : > { %215 = sbr.rel (%p212_p10) target bundleno = 489 (0x1e9), region = 40  ;;  %357 = vmatprep.mubr.f32.mxu0 (!%p212_p10), %v732_v0  ;;  %463 = vmatprep.mubr.f32.mxu1 (!%p212_p10), %v732_v0  ;;  %v259_v4 = vld [vmem:[%s907_s2 + $0x8] sm:$0xff] (!%p212_p10)  ;;  %v383_v5 = vld [vmem:[%s909_s4] sm:$0xff] (!%p212_p10)  ;;  %vm288_vm0 = vcmask (!%p212_p10), 1042432   ;;  %vm278_vm1 = vcmask (!%p212_p10), 23552   ;;  %vm389_vm2 = vcmask (!%p212_p10), 154624  }
  0x10   : > { %649 = vset.pattern.permute.xlu0 (!%p212_p10), %v733_v2  ;;  %650 = vset.pattern.permute.xlu1 (!%p212_p10), %v733_v2  ;;  %v255_v8 = vld [vmem:[%s906_s1] sm:$0xff] (!%p212_p10)  ;;  %v256_v9 = vld [vmem:[%s906_s1 + $0x8] sm:$0xff] (!%p212_p10)  ;;  %v257_v10 = vld [vmem:[%s906_s1 + $0x10] sm:$0x7] (!%p212_p10)  ;;  %s240_s13 = sand.u32 (!%p212_p10), 1, %s714_s19   ;;  %s587_s15 = sshll.u32 (!%p212_p10), %s722_s21, 8 }
  0x11   : > { %263 = vperm.xlu0 (!%p212_p10), %649, %v258_v1   ;;  %273 = vperm.xlu1 (!%p212_p10), %650, %v260_v3   ;;  %v382_v34 = vld [vmem:[%s908_s3] sm:$0xff] (!%p212_p10)  ;;  %s570_s14 = sshll.u32 (!%p212_p10), %s240_s13, 4  ;;  %s858_s27 = scalar_lea.hbm (!%p212_p10), %s910_s5, %s587_s15 }
  0x12   : > { %s242_s16 = scalar_lea.vmem (!%p212_p10), [#allocation2], %s570_s14  ;;  %s734_s7 = smov (!%p212_p10), [#allocation2]  }
  0x13   : > { %s489_s17 = sshll.u32 (!%p212_p10), %s242_s16, 4  ;;  %s656_s8 = sshll.u32 (!%p212_p10), %s734_s7, 4  ;;  %s860_s17 = int_to_ptr.vmem [resolvable:$true] %s489_s17  ;;  %s657_s8 = int_to_ptr.vmem [resolvable:$false] %s656_s8 }
  0x14   : > { %s652_s29 = scalar_lea.vmem (!%p212_p10), %s860_s17, 256  ;;  %p659_p1 = scmp.lt.s32.totalorder (!%p212_p10), %s860_s17, %s657_s8 }
  0x15   : > { %268 = vperm.xlu0 (!%p212_p10), %649, %v259_v4   ;;  %386 = vperm.xlu1 (!%p212_p10), %650, %v383_v5   ;;  %p653_p12 = scmp.ne.s32.totalorder (!%p212_p10), %s860_s17, %s652_s29 }
  0x16   : > { %s245_s9 = scalar_select %p244_p11, %s722_s21, 1 }
  0x17   : > { %s473_s21 = scalar_lea.sflag [#allocation3], %s240_s13  ;;  %p654_p13 = pnand %p653_p12, %p805_p4 }
  0x18   : > { %s586_s12 = sshll.u32 %s245_s9, 3  ;;  %s658_s9 = scalar_lea.vmem %s657_s8, 512 }
  0x19   : > { %s251_s25 = scalar_lea.vmem %s905_s0, %s586_s12  ;;  %p655_p0 = pneg %p654_p13 }
  0x1a   : > { %v254_v6 = vld [vmem:[%s251_s25] sm:$0x77]  ;;  %p660_p2 = scmp.lt.s32.totalorder %s658_s9, %s652_s29 }
  0x1b   : > { %v277_v7 = vcombine.high %v254_v6, %v254_v6 }
  0x1c   : > { %p661_p3 = por %p660_p2, %p659_p1 }
  0x1d   : > { %573 = vmatprep.subr.msk.mxu0 %vm288_vm0, %v277_v7 }
  0x1e   : > { %574 = vmatpush1.msk.msra.mxu0 %vm288_vm0, %v254_v6  ;;  %p662_p5 = pnand %p661_p3, %p655_p0 }
  0x1f   : > { %575 = vmatmul.mubr.msk.f32.vlgmr.msra.gmra.mrb[0].mxu0 %vm278_vm1, %v255_v8 }
  0x20   : > { %363 = vmatprep.mubr.f32.mxu0 %v732_v0 }
  0x23   : > { %576 = vmatmul.mubr.msk.f32.gmra.mrb[2].mxu0 %vm278_vm1, %v256_v9 }
  0x24   : > { %369 = vmatprep.mubr.f32.mxu0 %v732_v0 }
  0x27   : > { %577 = vmatmul.mubr.msk.f32.gmra.mrb[4].mxu0 %vm278_vm1, %v257_v10 }
  0x90   : > { %v264_v11 = vpop.permute.xlu0 %263  ;;  %v274_v26 = vpop.permute.xlu1 %273 }
  0x94   : > { %v269_v15 = vpop.permute.xlu0 %268  ;;  %v387_v35 = vpop.permute.xlu1 %386 }
  0xf2   : > { %v359_v12 = vpop.f32.mrb[0].mxu0 }
  0xf3   : > { %v361_v13 = vpop.f32.mrb[1].mxu0  ;;  %v360_v14 = vadd.f32 %v359_v12, %v264_v11 }
  0xf4   : > { %v362_v16 = vadd.f32 %v361_v13, %v264_v11 }
  0xf5   : > { %v376_v21 = vmax.f32 %v360_v14, 0.0 }
  0xf6   : > { %v365_v17 = vpop.f32.mrb[2].mxu0  ;;  %v377_v23 = vmax.f32 %v362_v16, 0.0 }
  0xf7   : > { %v366_v18 = vadd.f32 %v365_v17, %v269_v15  ;;  %v367_v19 = vpop.f32.mrb[3].mxu0 }
  0xf8   : > { %v368_v20 = vadd.f32 %v367_v19, %v269_v15 }
  0xf9   : > { %v378_v22 = vmax.f32 %v366_v18, 0.0 }
  0xfa   : > { %v379_v24 = vmax.f32 %v368_v20, 0.0  ;;  %v371_v25 = vpop.f32.mrb[4].mxu0 }
  0xfb   : > { %v373_v27 = vpop.f32.mrb[5].mxu0  ;;  %v590_v28 = vpack.c.bf16 %v378_v22, %v376_v21  ;;  %v372_v31 = vadd.f32 %v371_v25, %v274_v26 }
  0xfc   : > { %v374_v29 = vadd.f32 %v373_v27, %v274_v26  ;;  %v588_v30 = vpack.c.bf16 %v379_v24, %v377_v23 }
  0xfd   : > { %v380_v33 = vmax.f32 %v372_v31, 0.0 }
  0xfe   : > { %v381_v32 = vmax.f32 %v374_v29, 0.0  ;;  %589 = vmatprep.subr.bf16.mxu1 %v588_v30 }
  0xff   : > { %591 = vmatpush1.bf16.msra.mxu1 %v590_v28 }
 0x100   : > { %578 = vmatprep.subr.msk.mxu1 %vm288_vm0, %v381_v32 }
 0x103   : > { %579 = vmatpush1.msk.msra.mxu1 %vm288_vm0, %v380_v33 }
 0x104   : > { %580 = vmatmul.mubr.msk.f32.vlgmr.msra.gmra.mrb[0].mxu1 %vm389_vm2, %v382_v34 }
 0x1d7   : > { %v465_v36 = vpop.f32.mrb[0].mxu1 }
 0x1d8   : > { %v466_v37 = vadd.f32 %v465_v36, %v387_v35  ;;  %v467_v38 = vpop.f32.mrb[1].mxu1 }
 0x1d9   : > { %v468_v39 = vadd.f32 %v467_v38, %v387_v35 }
 0x1da   : > { %470 = vst [vmem:[%s242_s16] sm:$0xff] %v466_v37 }
 0x1db   : > { %471 = vst [vmem:[%s242_s16 + $0x8] sm:$0xff] %v468_v39 }
 0x1dc   : > { %665 = shalt.err (!%p662_p5)
}
 0x1dd   : > { %s666_s10 = scalar_lea.hbm %s858_s27, 256  ;;  %s670_s13 = scalar_lea.hbm %s910_s5, 512 }
 0x1de   : > { %p667_p6 = scmp.ne.s32.totalorder %s858_s27, %s666_s10  ;;  %p671_p10 = scmp.lt.u32.totalorder %s858_s27, %s910_s5 }
 0x1df   : > { %p672_p11 = scmp.lt.u32.totalorder %s670_s13, %s666_s10  ;;  %p674_p13 = scmp.lt.u32.totalorder %s666_s10, %s858_s27 }
 0x1e0   : > { %p668_p7 = pnand %p667_p6, %p805_p4 }
 0x1e1   : > { %p673_p12 = por %p672_p11, %p671_p10 }
 0x1e2   : > { %p669_p9 = pneg %p668_p7 }
 0x1e3   : > { %p675_p0 = por %p674_p13, %p673_p12 }
 0x1e5   : > { %p676_p1 = pnand %p675_p0, %p669_p9 }
 0x1e7   : > { %679 = shalt.err (!%p676_p1)
}
 0x1e8   : > { %592 = dma.vmem_to_hbm [thread:$0]  (%p805_p4), %s860_s17, 256, %s858_s27, %s473_s21  }
 0x1e9 PF: > { %p598_p2 = scmp.ge.s32.totalorder %s730_s23, 2  ;;  %s501_s16 = sand.u32 1, %s710_s18  }
 0x1ea   : > { %s502_s24 = scalar_lea.sflag [#allocation3], %s501_s16 }
 0x1eb   : > { %p595_p3 = pnand %p598_p2, %p812_p8 }
 0x1ed   : > { %705 = dma.done.wait (!%p595_p3), %s502_s24, 256  }
 0x1ee   : > { %707 = vsyncadd (!%p595_p3), %s502_s24, 4294967040  ;;  %s18_s23 = sadd.s32 1, %s730_s23   ;;  %s913_s18 = smov %s714_s19 }
 0x1ef   : > { %p15_p5 = scmp.ge.s32.totalorder %s18_s23, 4   ;;  %s914_s19 = smov %s718_s20 }
 0x1f0   : > { %s915_s20 = smov %s818_s6  ;;  %s916_s21 = smov %s726_s22 }
 0x1f1   : > { %s917_s22 = smov %s919_s26  ;;  %17 = sbr.rel (!%p15_p5) target bundleno = 4 (0x4), region = 75 }
 0x1f8   :  { %507 = vsyncpa [#allocation3], 1 }
 0x1f9   :  { %509 = vsyncpa [#allocation3 + $0x1], 1 }

</bundles_post_ra>
